<compile_context>
chip_gen: v7x
topology: tpu7x:2x2x1
jax: 0.10.0
libtpu: 0.0.40
codegen_flags: <defaults>
</compile_context>

<pallas_src>
import jax
import jax.numpy as jnp
import numpy as np
from jax.experimental import pallas as pl
from jax.experimental.pallas import tpu as pltpu


# ----------------------------------------------------------------------------
# Kernel
# ----------------------------------------------------------------------------
def fcn_head_kernel(x_ref, w1_ref, s1_ref, w2_ref, o_ref):
    """Fused FCNHead forward for one (TM, Cin) row tile.

    x_ref  : (TM, Cin)   bf16 activations (rows = flattened batch*length)
    w1_ref : (Cin, Chid) bf16, first 1x1 conv weight (transposed)
    s1_ref : (2, Chid)   f32 folded BN (row 0 = scale, row 1 = shift)
    w2_ref : (Chid, Cout) bf16, second 1x1 conv weight (transposed)
    o_ref  : (TM, Cout)  f32 softmax output
    """
    # 1x1 conv #1 on the MXU (bf16 in, f32 accumulate) + folded BN + ReLU.
    h = jnp.dot(x_ref[...], w1_ref[...], preferred_element_type=jnp.float32)
    h = jnp.maximum(h * s1_ref[0:1, :] + s1_ref[1:2, :], 0.0)          # (TM, Chid) f32

    # TODO(synk): Dropout(0.1) is identity at inference; training-mode RNG mask
    # is not implemented here.

    # 1x1 conv #2.
    logits = jnp.dot(h.astype(w2_ref.dtype), w2_ref[...],
                     preferred_element_type=jnp.float32)               # (TM, Cout) f32

    # Softmax over the channel (lane) axis.
    m = jnp.max(logits, axis=-1, keepdims=True)
    e = jnp.exp(logits - m)
    denom = jnp.sum(e, axis=-1, keepdims=True)
    o_ref[...] = (e / denom).astype(o_ref.dtype)                       # single dense store


# ----------------------------------------------------------------------------
# Parameter init (deterministic, synthetic) + BN folding
# ----------------------------------------------------------------------------
def init_fcn_head_params(key, in_channels, channels, eps=1e-5):
    assert in_channels % 4 == 0
    hidden = in_channels // 4
    k1, k2, k3, k4, k5, k6 = jax.random.split(key, 6)
    w1 = 0.1 * jax.random.normal(k1, (hidden, in_channels), jnp.float32)   # (Chid, Cin)
    w2 = 0.1 * jax.random.normal(k2, (channels, hidden), jnp.float32)      # (Cout, Chid)
    gamma = jax.random.uniform(k3, (hidden,), jnp.float32, 0.5, 1.5)
    beta = 0.1 * jax.random.normal(k4, (hidden,), jnp.float32)
    mean = 0.1 * jax.random.normal(k5, (hidden,), jnp.float32)
    var = jax.random.uniform(k6, (hidden,), jnp.float32, 0.5, 1.5)
    scale = gamma / jnp.sqrt(var + eps)
    shift = beta - mean * scale
    s1 = jnp.stack([scale, shift], axis=0)                                 # (2, Chid)
    return {"w1": w1, "s1": s1, "w2": w2}


# ----------------------------------------------------------------------------
# Wrapper (pallas_call plumbing + layout glue)
# ----------------------------------------------------------------------------
def _pick_row_tile(rows):
    for tm in (512, 256, 128, 64, 32, 16, 8):
        if rows % tm == 0:
            return tm
    return rows


def fcn_head_forward(params, x):
    """x: (B, C_in, L) float32, NCL like PyTorch. Returns (B, channels, L) f32."""
    B, Cin, L = x.shape
    Chid = params["w1"].shape[0]
    Cout = params["w2"].shape[0]
    rows = B * L
    tm = _pick_row_tile(rows)

    # NCL -> NLC -> (B*L, Cin); bf16 MXU inputs, f32 accumulation in-kernel.
    x_rows = jnp.transpose(x, (0, 2, 1)).reshape(rows, Cin).astype(jnp.bfloat16)
    w1T = jnp.transpose(params["w1"], (1, 0)).astype(jnp.bfloat16)     # (Cin, Chid)
    s1 = params["s1"].astype(jnp.float32)                              # (2, Chid)
    w2T = jnp.transpose(params["w2"], (1, 0)).astype(jnp.bfloat16)     # (Chid, Cout)

    out = pl.pallas_call(
        fcn_head_kernel,
        out_shape=jax.ShapeDtypeStruct((rows, Cout), jnp.float32),
        grid_spec=pltpu.PrefetchScalarGridSpec(
            num_scalar_prefetch=0,
            grid=(rows // tm,),
            in_specs=[
                pl.BlockSpec((tm, Cin), lambda i: (i, 0)),
                pl.BlockSpec((Cin, Chid), lambda i: (0, 0)),
                pl.BlockSpec((2, Chid), lambda i: (0, 0)),
                pl.BlockSpec((Chid, Cout), lambda i: (0, 0)),
            ],
            out_specs=pl.BlockSpec((tm, Cout), lambda i: (i, 0)),
        ),
        compiler_params=pltpu.CompilerParams(dimension_semantics=("parallel",)),
    )(x_rows, w1T, s1, w2T)

    return jnp.transpose(out.reshape(B, L, Cout), (0, 2, 1))           # back to (B, Cout, L)


# ----------------------------------------------------------------------------
# Pure-JAX reference (for correctness check)
# ----------------------------------------------------------------------------
def fcn_head_reference(params, x):
    x = x.astype(jnp.float32)
    h = jnp.einsum("bcl,hc->bhl", x, params["w1"])                     # 1x1 conv
    scale = params["s1"][0][None, :, None]
    shift = params["s1"][1][None, :, None]
    h = jnp.maximum(h * scale + shift, 0.0)                            # BN + ReLU
    # Dropout(0.1): identity at inference.
    logits = jnp.einsum("bhl,oh->bol", h, params["w2"])                # 1x1 conv
    return jax.nn.softmax(logits, axis=1)


# ----------------------------------------------------------------------------
if __name__ == "__main__":
    key = jax.random.PRNGKey(0)
    kx, kp = jax.random.split(key)

    B, Cin, L = 2, 128, 128
    channels = 32
    x = jax.random.normal(kx, (B, Cin, L), jnp.float32)

    params = init_fcn_head_params(kp, Cin, channels)

    out = jax.block_until_ready(fcn_head_forward(params, x))
    assert out.shape == (B, channels, L), out.shape

    ref = fcn_head_reference(params, x)
    np.testing.assert_allclose(np.asarray(out), np.asarray(ref), rtol=2e-2, atol=2e-3)

    print("KERNEL_OK")
</pallas_src>

<mosaic_0001>
module attributes {stable_mosaic.version = 11 : i64} {
  func.func @fcn_head_kernel(%arg0: i32, %arg1: memref<256x128xbf16, #tpu.memory_space<vmem>>, %arg2: memref<128x32xbf16, #tpu.memory_space<vmem>>, %arg3: memref<2x32xf32, #tpu.memory_space<vmem>>, %arg4: memref<32x32xbf16, #tpu.memory_space<vmem>>, %arg5: memref<256x32xf32, #tpu.memory_space<vmem>>) attributes {dimension_semantics = [#tpu.dimension_semantics<parallel>], iteration_bounds = array<i64: 1>, scalar_prefetch = 0 : i64, scratch_operands = 0 : i64, tpu.core_type = #tpu.core_type<tc>, window_params = [{transform_indices = @transform_0, window_bounds = array<i64: 256, 128>}, {pipeline_mode = #tpu.pipeline_mode<synchronous>, transform_indices = @transform_1, window_bounds = array<i64: 128, 32>}, {pipeline_mode = #tpu.pipeline_mode<synchronous>, transform_indices = @transform_2, window_bounds = array<i64: 2, 32>}, {pipeline_mode = #tpu.pipeline_mode<synchronous>, transform_indices = @transform_3, window_bounds = array<i64: 32, 32>}, {transform_indices = @transform_4, window_bounds = array<i64: 256, 32>}]} {
    %c0 = arith.constant 0 : index
    %c0_0 = arith.constant 0 : index
    %0 = vector.load %arg1[%c0, %c0_0] : memref<256x128xbf16, #tpu.memory_space<vmem>>, vector<256x128xbf16>
    %c0_1 = arith.constant 0 : index
    %c0_2 = arith.constant 0 : index
    %1 = vector.load %arg2[%c0_1, %c0_2] : memref<128x32xbf16, #tpu.memory_space<vmem>>, vector<128x32xbf16>
    %cst = arith.constant dense<0.000000e+00> : vector<256x32xf32>
    %2 = tpu.matmul %0, %1, %cst {dimension_numbers = #tpu.dot_dimension_numbers<[1], [0], [0], [1], [0, 0, 1, 1], [], []>} : vector<256x128xbf16>, vector<128x32xbf16>, vector<256x32xf32> -> vector<256x32xf32>
    %c0_3 = arith.constant 0 : index
    %c0_4 = arith.constant 0 : index
    %3 = vector.load %arg3[%c0_3, %c0_4] : memref<2x32xf32, #tpu.memory_space<vmem>>, vector<1x32xf32>
    %4 = vector.broadcast %3 : vector<1x32xf32> to vector<256x32xf32>
    %5 = arith.mulf %2, %4 : vector<256x32xf32>
    %c1 = arith.constant 1 : index
    %c0_5 = arith.constant 0 : index
    %6 = vector.load %arg3[%c1, %c0_5] : memref<2x32xf32, #tpu.memory_space<vmem>>, vector<1x32xf32>
    %7 = vector.broadcast %6 : vector<1x32xf32> to vector<256x32xf32>
    %8 = arith.addf %5, %7 : vector<256x32xf32>
    %cst_6 = arith.constant 0.000000e+00 : f32
    %9 = vector.broadcast %cst_6 : f32 to vector<256x32xf32>
    %10 = arith.maximumf %8, %9 : vector<256x32xf32>
    %11 = arith.truncf %10 : vector<256x32xf32> to vector<256x32xbf16>
    %c0_7 = arith.constant 0 : index
    %c0_8 = arith.constant 0 : index
    %12 = vector.load %arg4[%c0_7, %c0_8] : memref<32x32xbf16, #tpu.memory_space<vmem>>, vector<32x32xbf16>
    %cst_9 = arith.constant dense<0.000000e+00> : vector<256x32xf32>
    %13 = tpu.matmul %11, %12, %cst_9 {dimension_numbers = #tpu.dot_dimension_numbers<[1], [0], [0], [1], [0, 0, 1, 1], [], []>} : vector<256x32xbf16>, vector<32x32xbf16>, vector<256x32xf32> -> vector<256x32xf32>
    %cst_10 = arith.constant dense<0xFF800000> : vector<256xf32>
    %14 = vector.multi_reduction <maximumf>, %13, %cst_10 [1] : vector<256x32xf32> to vector<256xf32>
    %15 = vector.shape_cast %14 : vector<256xf32> to vector<256x1xf32>
    %16 = vector.broadcast %15 : vector<256x1xf32> to vector<256x32xf32>
    %17 = arith.subf %13, %16 : vector<256x32xf32>
    %18 = math.exp %17 : vector<256x32xf32>
    %cst_11 = arith.constant dense<0.000000e+00> : vector<256xf32>
    %19 = vector.multi_reduction <add>, %18, %cst_11 [1] : vector<256x32xf32> to vector<256xf32>
    %20 = vector.shape_cast %19 : vector<256xf32> to vector<256x1xf32>
    %21 = vector.broadcast %20 : vector<256x1xf32> to vector<256x32xf32>
    %22 = arith.divf %18, %21 : vector<256x32xf32>
    %c0_12 = arith.constant 0 : index
    %c0_13 = arith.constant 0 : index
    %23 = vector.load %arg5[%c0_12, %c0_13] : memref<256x32xf32, #tpu.memory_space<vmem>>, vector<256x32xf32>
    tpu.vector_store %arg5[%c0_12, %c0_13], %22 {strides = array<i32>} : memref<256x32xf32, #tpu.memory_space<vmem>>, vector<256x32xf32>,
    return
  }
  func.func @transform_0(%arg0: i32) -> (i32, i32) {
    %c0_i32 = arith.constant 0 : i32
    %c0_i32_0 = arith.constant 0 : i32
    return %arg0, %c0_i32 : i32, i32
  }
  func.func @transform_1(%arg0: i32) -> (i32, i32) {
    %c0_i32 = arith.constant 0 : i32
    %c0_i32_0 = arith.constant 0 : i32
    %c0_i32_1 = arith.constant 0 : i32
    return %c0_i32, %c0_i32_0 : i32, i32
  }
  func.func @transform_2(%arg0: i32) -> (i32, i32) {
    %c0_i32 = arith.constant 0 : i32
    %c0_i32_0 = arith.constant 0 : i32
    %c0_i32_1 = arith.constant 0 : i32
    return %c0_i32, %c0_i32_0 : i32, i32
  }
  func.func @transform_3(%arg0: i32) -> (i32, i32) {
    %c0_i32 = arith.constant 0 : i32
    %c0_i32_0 = arith.constant 0 : i32
    %c0_i32_1 = arith.constant 0 : i32
    return %c0_i32, %c0_i32_0 : i32, i32
  }
  func.func @transform_4(%arg0: i32) -> (i32, i32) {
    %c0_i32 = arith.constant 0 : i32
    %c0_i32_0 = arith.constant 0 : i32
    return %arg0, %c0_i32 : i32, i32
  }
}

</mosaic_0001>

<bundles_post_ra>
// kernel: tpu_custom_call.1
= control target key start
LH: loop header
LB: loop body
LE: loop exit
PB: predicated region body
PF: predicated region fallthrough
CT: control target
= control target key end

     0   :  { %9 = vsyncpa [#allocation3], 0  ;;  %s1473_s15 = smov [#allocation2]   ;;  %s2081_s0 = inlined_call_operand.hbm [shape: bf16[256,128], index: 0, kind: input, shape index: {}]   ;;  %s2082_s1 = inlined_call_operand.vmem [shape: bf16[128,32], index: 1, kind: input, shape index: {}]   ;;  %s2083_s2 = inlined_call_operand.vmem [shape: f32[2,32], index: 2, kind: input, shape index: {}]   ;;  %s2084_s3 = inlined_call_operand.vmem [shape: bf16[32,32], index: 3, kind: input, shape index: {}]   ;;  %s2085_s4 = inlined_call_operand.vmem [shape: f32[256,32], index: 4, kind: output, shape index: {}]  }
   0x1   :  { %s15_s16 = sshll.u32 %s1473_s15, 4  ;;  %s1449_s19 = scalar_lea.hbm %s2081_s0, 2048  ;;  %s16_s16 = int_to_ptr.vmem [resolvable:$true] %s15_s16 }
   0x2   :  { %p1450_p0 = scmp.ne.s32.totalorder %s2081_s0, %s1449_s19  ;;  %p1453_p1 = scmp.lt.u32.totalorder %s1449_s19, %s2081_s0 }
   0x4   :  { %p1455_p2 = pnand %p1453_p1, %p1450_p0 }
   0x6   :  { %1458 = shalt.err (!%p1455_p2)
}
   0x7   :  { %s1459_s24 = scalar_lea.vmem %s16_s16, 2048  ;;  %p1464_p4 = scmp.lt.s32.totalorder %s16_s16, %s16_s16 }
   0x8   :  { %p1460_p3 = scmp.ne.s32.totalorder %s16_s16, %s1459_s24  ;;  %p1465_p5 = scmp.lt.s32.totalorder %s1459_s24, %s1459_s24 }
   0xa   :  { %p1466_p6 = por %p1465_p5, %p1464_p4 }
   0xc   :  { %p1467_p7 = pnand %p1466_p6, %p1460_p3 }
   0xe   :  { %1470 = shalt.err (!%p1467_p7)
}
   0xf   :  { %s1474_s25 = smov 64   ;;  %s1475_s26 = smov 4  }
  0x10   :  { %21 = dma.hbm_to_vmem [thread:$0]  %s2081_s0, 2048, %s16_s16, [#allocation3], %s1474_s25, %s1474_s25, %s1475_s26  }
  0x11   :  { %1471 = dma.done.wait [#allocation3], 2048  }
  0x12   :  { %1472 = vsyncadd [#allocation3], 4294965248  ;;  %v1295_v0 = vld [vmem:[%s2082_s1] sm:$0xff]   ;;  %v1296_v1 = vld [vmem:[%s2082_s1 + $0x8] sm:$0xff]   ;;  %vm523_vm0 = vcmask 261120  }
  0x13   :  { %1208 = vmatprep.subr.bf16.mxu0 %v1295_v0  ;;  %v1297_v2 = vld [vmem:[%s2082_s1 + $0x10] sm:$0xff]   ;;  %v1298_v3 = vld [vmem:[%s2082_s1 + $0x18] sm:$0xff]   ;;  %v1303_v4 = vld [vmem:[#allocation2] sm:$0xff]  }
  0x14   :  { %1209 = vmatpush3.bf16.msra.mxu0 %v1295_v0  ;;  %1224 = vmatprep.mubr.bf16.mxu0 %v1303_v4  ;;  %v1299_v5 = vld [vmem:[%s2082_s1 + $0x20] sm:$0xff]   ;;  %v1300_v6 = vld [vmem:[%s2082_s1 + $0x28] sm:$0xff]   ;;  %v1301_v7 = vld [vmem:[%s2082_s1 + $0x30] sm:$0xff]  }
  0x15   :  { %1210 = vmatprep.subr.bf16.mxu0 %v1296_v1  ;;  %v1302_v8 = vld [vmem:[%s2082_s1 + $0x38] sm:$0xff]   ;;  %v1304_v9 = vld [vmem:[#allocation2 + $0x8] sm:$0xff]   ;;  %v1305_v10 = vld [vmem:[#allocation2 + $0x10] sm:$0xff]  }
  0x16   :  { %v1306_v11 = vld [vmem:[#allocation2 + $0x18] sm:$0xff]   ;;  %v1307_v12 = vld [vmem:[#allocation2 + $0x20] sm:$0xff]   ;;  %v1308_v13 = vld [vmem:[#allocation2 + $0x28] sm:$0xff]  }
  0x17   :  { %v1309_v14 = vld [vmem:[#allocation2 + $0x30] sm:$0xff]   ;;  %v1310_v15 = vld [vmem:[#allocation2 + $0x38] sm:$0xff]   ;;  %v1311_v16 = vld [vmem:[#allocation2 + $0x40] sm:$0xff]  }
  0x18   :  { %1211 = vmatpush3.bf16.msra.mxu0 %v1296_v1  ;;  %v1312_v17 = vld [vmem:[#allocation2 + $0x48] sm:$0xff]   ;;  %v1313_v18 = vld [vmem:[#allocation2 + $0x50] sm:$0xff]   ;;  %v1314_v19 = vld [vmem:[#allocation2 + $0x58] sm:$0xff]  }
  0x19   :  { %1212 = vmatprep.subr.bf16.mxu0 %v1297_v2  ;;  %v1315_v20 = vld [vmem:[#allocation2 + $0x60] sm:$0xff]   ;;  %v1316_v21 = vld [vmem:[#allocation2 + $0x68] sm:$0xff]   ;;  %v1317_v22 = vld [vmem:[#allocation2 + $0x70] sm:$0xff]  }
  0x1a   :  { %v1318_v23 = vld [vmem:[#allocation2 + $0x78] sm:$0xff]   ;;  %v1319_v24 = vld [vmem:[%s2084_s3] sm:$0xff]   ;;  %v1320_v25 = vld [vmem:[%s2084_s3 + $0x8] sm:$0xff]  }
  0x1b   :  { %1256 = vmatprep.subr.bf16.mxu1 %v1319_v24  ;;  %v1546_v26 = vld [vmem:[%s2083_s2] ss:$0 sm:$0xff]  ;;  %v1551_v28 = vld [vmem:[%s2083_s2 + $0x1] ss:$0 sm:$0xff] }
  0x1c   :  { %1213 = vmatpush3.bf16.msra.mxu0 %v1297_v2  ;;  %1257 = vmatpush3.bf16.msra.mxu1 %v1319_v24 }
  0x1d   :  { %1214 = vmatprep.subr.bf16.mxu0 %v1298_v3  ;;  %1258 = vmatprep.subr.bf16.mxu1 %v1320_v25 }
  0x20   :  { %1215 = vmatpush3.bf16.msra.mxu0 %v1298_v3  ;;  %1259 = vmatpush3.bf16.msra.mxu1 %v1320_v25 }
  0x21   :  { %1216 = vmatprep.subr.bf16.mxu0 %v1299_v5 }
  0x24   :  { %1217 = vmatpush3.bf16.msra.mxu0 %v1299_v5 }
  0x25   :  { %1218 = vmatprep.subr.bf16.mxu0 %v1300_v6 }
  0x28   :  { %1219 = vmatpush3.bf16.msra.mxu0 %v1300_v6 }
  0x29   :  { %1220 = vmatprep.subr.bf16.mxu0 %v1301_v7 }
  0x2c   :  { %1221 = vmatpush3.bf16.msra.mxu0 %v1301_v7 }
  0x2d   :  { %1222 = vmatprep.subr.bf16.mxu0 %v1302_v8 }
  0x30   :  { %1223 = vmatpush3.bf16.msra.mxu0 %v1302_v8 }
  0x33   :  { %1225 = vmatmul.mubr.bf16.vlgmr.msra.gmra.mrb[0].mxu0 %v1304_v9 }
  0x34   :  { %1228 = vmatprep.mubr.bf16.mxu0 %v1305_v10 }
  0x3b   :  { %1229 = vmatmul.mubr.bf16.gmra.mrb[4].mxu0 %v1306_v11 }
  0x3c   :  { %1232 = vmatprep.mubr.bf16.mxu0 %v1307_v12 }
  0x43   :  { %1233 = vmatmul.mubr.bf16.gmra.mrb[8].mxu0 %v1308_v13 }
  0x44   :  { %1236 = vmatprep.mubr.bf16.mxu0 %v1309_v14 }
  0x4b   :  { %1237 = vmatmul.mubr.bf16.gmra.mrb[12].mxu0 %v1310_v15 }
  0x4c   :  { %1240 = vmatprep.mubr.bf16.mxu0 %v1311_v16 }
  0x53   :  { %1241 = vmatmul.mubr.bf16.gmra.mrb[16].mxu0 %v1312_v17 }
  0x54   :  { %1244 = vmatprep.mubr.bf16.mxu0 %v1313_v18 }
  0x5b   :  { %1245 = vmatmul.mubr.bf16.gmra.mrb[20].mxu0 %v1314_v19 }
  0x5c   :  { %1248 = vmatprep.mubr.bf16.mxu0 %v1315_v20 }
  0x63   :  { %1249 = vmatmul.mubr.bf16.gmra.mrb[24].mxu0 %v1316_v21 }
  0x64   :  { %1252 = vmatprep.mubr.bf16.mxu0 %v1317_v22 }
  0x6b   :  { %1253 = vmatmul.mubr.bf16.gmra.mrb[28].mxu0 %v1318_v23 }
 0x106   :  { %v1226_v27 = vpop.f32.mrb[0].mxu0 }
 0x107   :  { %v392_v29 = vmul.f32 %v1226_v27, %v1546_v26  ;;  %v258_v30 = vpop.f32.mrb[1].mxu0 }
 0x108   :  { %v390_v31 = vmul.f32 %v1546_v26, %v258_v30  ;;  %v1227_v32 = vpop.f32.mrb[2].mxu0 }
 0x109   :  { %v429_v33 = vadd.f32 %v1551_v28, %v392_v29  ;;  %v393_v34 = vmul.f32 %v1227_v32, %v1546_v26  ;;  %v261_v35 = vpop.f32.mrb[3].mxu0 }
 0x10a   :  { %v427_v36 = vadd.f32 %v1551_v28, %v390_v31  ;;  %v391_v37 = vmul.f32 %v1546_v26, %v261_v35 }
 0x10b   :  { %v430_v38 = vadd.f32 %v1551_v28, %v393_v34  ;;  %v461_v40 = vmax.f32 %v429_v33, 0.0 }
 0x10c   :  { %v428_v39 = vadd.f32 %v1551_v28, %v391_v37  ;;  %v459_v42 = vmax.f32 %v427_v36, 0.0 }
 0x10d   :  { %v462_v41 = vmax.f32 %v430_v38, 0.0 }
 0x10e   :  { %v460_v43 = vmax.f32 %v428_v39, 0.0  ;;  %v1230_v44 = vpop.f32.mrb[4].mxu0 }
 0x10f   :  { %v492_v45 = vpack.c.bf16 %v462_v41, %v461_v40  ;;  %v396_v46 = vmul.f32 %v1230_v44, %v1546_v26  ;;  %v274_v47 = vpop.f32.mrb[5].mxu0 }
 0x110   :  { %v394_v48 = vmul.f32 %v1546_v26, %v274_v47  ;;  %v1231_v49 = vpop.f32.mrb[6].mxu0  ;;  %v491_v50 = vpack.c.bf16 %v460_v43, %v459_v42 }
 0x111   :  { %v433_v51 = vadd.f32 %v1551_v28, %v396_v46  ;;  %v397_v52 = vmul.f32 %v1231_v49, %v1546_v26  ;;  %v277_v53 = vpop.f32.mrb[7].mxu0 }
 0x112   :  { %v431_v54 = vadd.f32 %v1551_v28, %v394_v48  ;;  %v395_v55 = vmul.f32 %v1546_v26, %v277_v53  ;;  %1260 = vmatprep.mubr.msk.bf16.mxu1 %vm523_vm0, %v491_v50 }
 0x113   :  { %v465_v56 = vmax.f32 %v433_v51, 0.0  ;;  %v434_v57 = vadd.f32 %v1551_v28, %v397_v52  ;;  %1261 = vmatmul.mubr.msk.bf16.vlgmr.msra.gmra.mrb[0].mxu1 %vm523_vm0, %v492_v45 }
 0x114   :  { %v432_v58 = vadd.f32 %v1551_v28, %v395_v55  ;;  %v463_v60 = vmax.f32 %v431_v54, 0.0 }
 0x115   :  { %v466_v59 = vmax.f32 %v434_v57, 0.0 }
 0x116   :  { %v464_v61 = vmax.f32 %v432_v58, 0.0  ;;  %v1234_v62 = vpop.f32.mrb[8].mxu0 }
 0x117   :  { %v494_v63 = vpack.c.bf16 %v466_v59, %v465_v56  ;;  %v400_v0 = vmul.f32 %v1234_v62, %v1546_v26  ;;  %v290_v1 = vpop.f32.mrb[9].mxu0 }
 0x118   :  { %v493_v2 = vpack.c.bf16 %v464_v61, %v463_v60  ;;  %v398_v3 = vmul.f32 %v1546_v26, %v290_v1  ;;  %v1235_v4 = vpop.f32.mrb[10].mxu0 }
 0x119   :  { %v437_v5 = vadd.f32 %v1551_v28, %v400_v0  ;;  %v401_v6 = vmul.f32 %v1235_v4, %v1546_v26  ;;  %v293_v7 = vpop.f32.mrb[11].mxu0 }
 0x11a   :  { %v435_v8 = vadd.f32 %v1551_v28, %v398_v3  ;;  %v399_v9 = vmul.f32 %v1546_v26, %v293_v7  ;;  %1264 = vmatprep.mubr.msk.bf16.mxu1 %vm523_vm0, %v493_v2 }
 0x11b   :  { %v469_v10 = vmax.f32 %v437_v5, 0.0  ;;  %v438_v11 = vadd.f32 %v1551_v28, %v401_v6  ;;  %1265 = vmatmul.mubr.msk.bf16.gmra.mrb[4].mxu1 %vm523_vm0, %v494_v63 }
 0x11c   :  { %v436_v12 = vadd.f32 %v1551_v28, %v399_v9  ;;  %v467_v14 = vmax.f32 %v435_v8, 0.0 }
 0x11d   :  { %v470_v13 = vmax.f32 %v438_v11, 0.0 }
 0x11e   :  { %v468_v15 = vmax.f32 %v436_v12, 0.0  ;;  %v1238_v16 = vpop.f32.mrb[12].mxu0 }
 0x11f   :  { %v496_v17 = vpack.c.bf16 %v470_v13, %v469_v10  ;;  %v404_v18 = vmul.f32 %v1238_v16, %v1546_v26  ;;  %v306_v19 = vpop.f32.mrb[13].mxu0 }
 0x120   :  { %v495_v20 = vpack.c.bf16 %v468_v15, %v467_v14  ;;  %v402_v21 = vmul.f32 %v1546_v26, %v306_v19  ;;  %v1239_v22 = vpop.f32.mrb[14].mxu0 }
 0x121   :  { %v441_v23 = vadd.f32 %v1551_v28, %v404_v18  ;;  %v405_v24 = vmul.f32 %v1239_v22, %v1546_v26  ;;  %v309_v25 = vpop.f32.mrb[15].mxu0 }
 0x122   :  { %v439_v27 = vadd.f32 %v1551_v28, %v402_v21  ;;  %v403_v29 = vmul.f32 %v1546_v26, %v309_v25  ;;  %1268 = vmatprep.mubr.msk.bf16.mxu1 %vm523_vm0, %v495_v20 }
 0x123   :  { %v473_v30 = vmax.f32 %v441_v23, 0.0  ;;  %v442_v31 = vadd.f32 %v1551_v28, %v405_v24  ;;  %1269 = vmatmul.mubr.msk.bf16.gmra.mrb[8].mxu1 %vm523_vm0, %v496_v17 }
 0x124   :  { %v440_v32 = vadd.f32 %v1551_v28, %v403_v29  ;;  %v471_v34 = vmax.f32 %v439_v27, 0.0 }
 0x125   :  { %v474_v33 = vmax.f32 %v442_v31, 0.0 }
 0x126   :  { %v472_v35 = vmax.f32 %v440_v32, 0.0  ;;  %v1242_v36 = vpop.f32.mrb[16].mxu0 }
 0x127   :  { %v498_v37 = vpack.c.bf16 %v474_v33, %v473_v30  ;;  %v408_v38 = vmul.f32 %v1242_v36, %v1546_v26  ;;  %v322_v39 = vpop.f32.mrb[17].mxu0 }
 0x128   :  { %v497_v40 = vpack.c.bf16 %v472_v35, %v471_v34  ;;  %v406_v41 = vmul.f32 %v1546_v26, %v322_v39  ;;  %v1243_v42 = vpop.f32.mrb[18].mxu0 }
 0x129   :  { %v445_v43 = vadd.f32 %v1551_v28, %v408_v38  ;;  %v409_v44 = vmul.f32 %v1243_v42, %v1546_v26  ;;  %v325_v45 = vpop.f32.mrb[19].mxu0 }
 0x12a   :  { %v443_v46 = vadd.f32 %v1551_v28, %v406_v41  ;;  %v407_v47 = vmul.f32 %v1546_v26, %v325_v45  ;;  %1272 = vmatprep.mubr.msk.bf16.mxu1 %vm523_vm0, %v497_v40 }
 0x12b   :  { %v477_v48 = vmax.f32 %v445_v43, 0.0  ;;  %v446_v49 = vadd.f32 %v1551_v28, %v409_v44  ;;  %1273 = vmatmul.mubr.msk.bf16.gmra.mrb[12].mxu1 %vm523_vm0, %v498_v37 }
 0x12c   :  { %v444_v50 = vadd.f32 %v1551_v28, %v407_v47  ;;  %v475_v52 = vmax.f32 %v443_v46, 0.0 }
 0x12d   :  { %v478_v51 = vmax.f32 %v446_v49, 0.0 }
 0x12e   :  { %v476_v53 = vmax.f32 %v444_v50, 0.0  ;;  %v1246_v54 = vpop.f32.mrb[20].mxu0 }
 0x12f   :  { %v500_v55 = vpack.c.bf16 %v478_v51, %v477_v48  ;;  %v412_v56 = vmul.f32 %v1246_v54, %v1546_v26  ;;  %v338_v57 = vpop.f32.mrb[21].mxu0 }
 0x130   :  { %v499_v58 = vpack.c.bf16 %v476_v53, %v475_v52  ;;  %v410_v59 = vmul.f32 %v1546_v26, %v338_v57  ;;  %v1247_v60 = vpop.f32.mrb[22].mxu0 }
 0x131   :  { %v449_v61 = vadd.f32 %v1551_v28, %v412_v56  ;;  %v413_v62 = vmul.f32 %v1247_v60, %v1546_v26  ;;  %v341_v63 = vpop.f32.mrb[23].mxu0 }
 0x132   :  { %v447_v0 = vadd.f32 %v1551_v28, %v410_v59  ;;  %v411_v1 = vmul.f32 %v1546_v26, %v341_v63  ;;  %1276 = vmatprep.mubr.msk.bf16.mxu1 %vm523_vm0, %v499_v58 }
 0x133   :  { %v481_v2 = vmax.f32 %v449_v61, 0.0  ;;  %v450_v3 = vadd.f32 %v1551_v28, %v413_v62  ;;  %1277 = vmatmul.mubr.msk.bf16.gmra.mrb[16].mxu1 %vm523_vm0, %v500_v55 }
 0x134   :  { %v448_v4 = vadd.f32 %v1551_v28, %v411_v1  ;;  %v479_v6 = vmax.f32 %v447_v0, 0.0 }
 0x135   :  { %v482_v5 = vmax.f32 %v450_v3, 0.0 }
 0x136   :  { %v480_v7 = vmax.f32 %v448_v4, 0.0  ;;  %v1250_v8 = vpop.f32.mrb[24].mxu0 }
 0x137   :  { %v502_v9 = vpack.c.bf16 %v482_v5, %v481_v2  ;;  %v416_v10 = vmul.f32 %v1250_v8, %v1546_v26  ;;  %v354_v11 = vpop.f32.mrb[25].mxu0 }
 0x138   :  { %v501_v12 = vpack.c.bf16 %v480_v7, %v479_v6  ;;  %v414_v13 = vmul.f32 %v1546_v26, %v354_v11  ;;  %v1251_v14 = vpop.f32.mrb[26].mxu0 }
 0x139   :  { %v453_v15 = vadd.f32 %v1551_v28, %v416_v10  ;;  %v417_v16 = vmul.f32 %v1251_v14, %v1546_v26  ;;  %v357_v17 = vpop.f32.mrb[27].mxu0 }
 0x13a   :  { %v451_v18 = vadd.f32 %v1551_v28, %v414_v13  ;;  %v415_v19 = vmul.f32 %v1546_v26, %v357_v17  ;;  %1280 = vmatprep.mubr.msk.bf16.mxu1 %vm523_vm0, %v501_v12 }
 0x13b   :  { %v485_v20 = vmax.f32 %v453_v15, 0.0  ;;  %v454_v21 = vadd.f32 %v1551_v28, %v417_v16  ;;  %1281 = vmatmul.mubr.msk.bf16.gmra.mrb[20].mxu1 %vm523_vm0, %v502_v9 }
 0x13c   :  { %v452_v22 = vadd.f32 %v1551_v28, %v415_v19  ;;  %v483_v24 = vmax.f32 %v451_v18, 0.0 }
 0x13d   :  { %v486_v23 = vmax.f32 %v454_v21, 0.0 }
 0x13e   :  { %v484_v25 = vmax.f32 %v452_v22, 0.0  ;;  %v1254_v27 = vpop.f32.mrb[28].mxu0 }
 0x13f   :  { %v504_v29 = vpack.c.bf16 %v486_v23, %v485_v20  ;;  %v420_v30 = vmul.f32 %v1254_v27, %v1546_v26  ;;  %v370_v31 = vpop.f32.mrb[29].mxu0 }
 0x140   :  { %v503_v32 = vpack.c.bf16 %v484_v25, %v483_v24  ;;  %v418_v33 = vmul.f32 %v1546_v26, %v370_v31  ;;  %v1255_v34 = vpop.f32.mrb[30].mxu0 }
 0x141   :  { %v457_v35 = vadd.f32 %v1551_v28, %v420_v30  ;;  %v421_v36 = vmul.f32 %v1255_v34, %v1546_v26  ;;  %v373_v37 = vpop.f32.mrb[31].mxu0 }
 0x142   :  { %v455_v38 = vadd.f32 %v1551_v28, %v418_v33  ;;  %v419_v39 = vmul.f32 %v1546_v26, %v373_v37  ;;  %1284 = vmatprep.mubr.msk.bf16.mxu1 %vm523_vm0, %v503_v32 }
 0x143   :  { %v489_v40 = vmax.f32 %v457_v35, 0.0  ;;  %v458_v41 = vadd.f32 %v1551_v28, %v421_v36  ;;  %1285 = vmatmul.mubr.msk.bf16.gmra.mrb[24].mxu1 %vm523_vm0, %v504_v29 }
 0x144   :  { %v456_v42 = vadd.f32 %v1551_v28, %v419_v39  ;;  %v487_v44 = vmax.f32 %v455_v38, 0.0 }
 0x145   :  { %v490_v43 = vmax.f32 %v458_v41, 0.0 }
 0x146   :  { %v488_v45 = vmax.f32 %v456_v42, 0.0 }
 0x147   :  { %v506_v46 = vpack.c.bf16 %v490_v43, %v489_v40 }
 0x148   :  { %v505_v47 = vpack.c.bf16 %v488_v45, %v487_v44 }
 0x14a   :  { %1288 = vmatprep.mubr.msk.bf16.mxu1 %vm523_vm0, %v505_v47 }
 0x14b   :  { %1289 = vmatmul.mubr.msk.bf16.gmra.mrb[28].mxu1 %vm523_vm0, %v506_v46 }
 0x1e6   :  { %v1633_v48 = vpop.f32.mrb[0].mxu1 }
 0x1e7   :  { %v1635_v26 = vpop.f32.mrb[1].mxu1  ;;  %v739_v49 = vsel %vm523_vm0, %v1633_v48, -inf }
 0x1e8   :  { %740 = vmax.xlane.f32.xlu1 %v739_v49  ;;  %v1639_v50 = vpop.f32.mrb[2].mxu1  ;;  %v733_v28 = vsel %vm523_vm0, %v1635_v26, -inf }
 0x1e9   :  { %734 = vmax.xlane.f32.xlu0 %v733_v28  ;;  %v1643_v51 = vpop.f32.mrb[3].mxu1  ;;  %v742_v52 = vsel %vm523_vm0, %v1639_v50, -inf }
 0x1ea   :  { %v736_v53 = vsel %vm523_vm0, %v1643_v51, -inf }
 0x1ec   :  { %743 = vmax.xlane.f32.xlu1 %v742_v52 }
 0x1ed   :  { %737 = vmax.xlane.f32.xlu0 %v736_v53 }
 0x1ee   :  { %v1649_v54 = vpop.f32.mrb[4].mxu1 }
 0x1ef   :  { %v1651_v55 = vpop.f32.mrb[5].mxu1  ;;  %v751_v56 = vsel %vm523_vm0, %v1649_v54, -inf }
 0x1f0   :  { %v1655_v57 = vpop.f32.mrb[6].mxu1  ;;  %v745_v60 = vsel %vm523_vm0, %v1651_v55, -inf }
 0x1f1   :  { %752 = vmax.xlane.f32.xlu0 %v751_v56  ;;  %v1657_v58 = vpop.f32.mrb[7].mxu1  ;;  %v754_v59 = vsel %vm523_vm0, %v1655_v57, -inf }
 0x1f2   :  { %755 = vmax.xlane.f32.xlu1 %v754_v59  ;;  %v748_v61 = vsel %vm523_vm0, %v1657_v58, -inf }
 0x1f5   :  { %746 = vmax.xlane.f32.xlu0 %v745_v60 }
 0x1f6   :  { %749 = vmax.xlane.f32.xlu1 %v748_v61  ;;  %v1665_v62 = vpop.f32.mrb[8].mxu1 }
 0x1f7   :  { %v1667_v63 = vpop.f32.mrb[9].mxu1  ;;  %v763_v0 = vsel %vm523_vm0, %v1665_v62, -inf }
 0x1f8   :  { %v1671_v1 = vpop.f32.mrb[10].mxu1  ;;  %v757_v4 = vsel %vm523_vm0, %v1667_v63, -inf }
 0x1f9   :  { %764 = vmax.xlane.f32.xlu0 %v763_v0  ;;  %v1673_v2 = vpop.f32.mrb[11].mxu1  ;;  %v766_v3 = vsel %vm523_vm0, %v1671_v1, -inf }
 0x1fa   :  { %767 = vmax.xlane.f32.xlu1 %v766_v3  ;;  %v760_v5 = vsel %vm523_vm0, %v1673_v2, -inf }
 0x1fd   :  { %758 = vmax.xlane.f32.xlu0 %v757_v4 }
 0x1fe   :  { %761 = vmax.xlane.f32.xlu1 %v760_v5  ;;  %v1681_v6 = vpop.f32.mrb[12].mxu1 }
 0x1ff   :  { %v1683_v7 = vpop.f32.mrb[13].mxu1  ;;  %v775_v8 = vsel %vm523_vm0, %v1681_v6, -inf }
 0x200   :  { %v1687_v9 = vpop.f32.mrb[14].mxu1  ;;  %v769_v12 = vsel %vm523_vm0, %v1683_v7, -inf }
 0x201   :  { %776 = vmax.xlane.f32.xlu0 %v775_v8  ;;  %v1689_v10 = vpop.f32.mrb[15].mxu1  ;;  %v778_v11 = vsel %vm523_vm0, %v1687_v9, -inf }
 0x202   :  { %779 = vmax.xlane.f32.xlu1 %v778_v11  ;;  %v772_v13 = vsel %vm523_vm0, %v1689_v10, -inf }
 0x205   :  { %770 = vmax.xlane.f32.xlu0 %v769_v12 }
 0x206   :  { %773 = vmax.xlane.f32.xlu1 %v772_v13  ;;  %v1697_v14 = vpop.f32.mrb[16].mxu1 }
 0x207   :  { %v1699_v15 = vpop.f32.mrb[17].mxu1  ;;  %v787_v16 = vsel %vm523_vm0, %v1697_v14, -inf }
 0x208   :  { %v1703_v17 = vpop.f32.mrb[18].mxu1  ;;  %v781_v20 = vsel %vm523_vm0, %v1699_v15, -inf }
 0x209   :  { %788 = vmax.xlane.f32.xlu0 %v787_v16  ;;  %v1705_v18 = vpop.f32.mrb[19].mxu1  ;;  %v790_v19 = vsel %vm523_vm0, %v1703_v17, -inf }
 0x20a   :  { %791 = vmax.xlane.f32.xlu1 %v790_v19  ;;  %v784_v21 = vsel %vm523_vm0, %v1705_v18, -inf }
 0x20d   :  { %782 = vmax.xlane.f32.xlu0 %v781_v20 }
 0x20e   :  { %785 = vmax.xlane.f32.xlu1 %v784_v21  ;;  %v1713_v22 = vpop.f32.mrb[20].mxu1 }
 0x20f   :  { %v1715_v23 = vpop.f32.mrb[21].mxu1  ;;  %v799_v24 = vsel %vm523_vm0, %v1713_v22, -inf }
 0x210   :  { %v1719_v25 = vpop.f32.mrb[22].mxu1  ;;  %v793_v30 = vsel %vm523_vm0, %v1715_v23, -inf }
 0x211   :  { %800 = vmax.xlane.f32.xlu0 %v799_v24  ;;  %v1721_v27 = vpop.f32.mrb[23].mxu1  ;;  %v802_v29 = vsel %vm523_vm0, %v1719_v25, -inf }
 0x212   :  { %803 = vmax.xlane.f32.xlu1 %v802_v29  ;;  %v796_v31 = vsel %vm523_vm0, %v1721_v27, -inf }
 0x215   :  { %794 = vmax.xlane.f32.xlu0 %v793_v30 }
 0x216   :  { %797 = vmax.xlane.f32.xlu1 %v796_v31  ;;  %v1729_v32 = vpop.f32.mrb[24].mxu1 }
 0x217   :  { %v1731_v33 = vpop.f32.mrb[25].mxu1  ;;  %v811_v34 = vsel %vm523_vm0, %v1729_v32, -inf }
 0x218   :  { %v1735_v35 = vpop.f32.mrb[26].mxu1  ;;  %v805_v38 = vsel %vm523_vm0, %v1731_v33, -inf }
 0x219   :  { %812 = vmax.xlane.f32.xlu0 %v811_v34  ;;  %v1737_v36 = vpop.f32.mrb[27].mxu1  ;;  %v814_v37 = vsel %vm523_vm0, %v1735_v35, -inf }
 0x21a   :  { %815 = vmax.xlane.f32.xlu1 %v814_v37  ;;  %v808_v39 = vsel %vm523_vm0, %v1737_v36, -inf }
 0x21d   :  { %806 = vmax.xlane.f32.xlu0 %v805_v38 }
 0x21e   :  { %809 = vmax.xlane.f32.xlu1 %v808_v39  ;;  %v1745_v40 = vpop.f32.mrb[28].mxu1 }
 0x21f   :  { %v1747_v41 = vpop.f32.mrb[29].mxu1  ;;  %v823_v46 = vsel %vm523_vm0, %v1745_v40, -inf }
 0x220   :  { %v1749_v42 = vpop.f32.mrb[30].mxu1  ;;  %v817_v43 = vsel %vm523_vm0, %v1747_v41, -inf }
 0x221   :  { %818 = vmax.xlane.f32.xlu0 %v817_v43  ;;  %v1753_v44 = vpop.f32.mrb[31].mxu1  ;;  %v826_v47 = vsel %vm523_vm0, %v1749_v42, -inf }
 0x222   :  { %v820_v45 = vsel %vm523_vm0, %v1753_v44, -inf }
 0x223   :  { %821 = vmax.xlane.f32.xlu1 %v820_v45 }
 0x225   :  { %824 = vmax.xlane.f32.xlu0 %v823_v46 }
 0x227   :  { %827 = vmax.xlane.f32.xlu1 %v826_v47 }
 0x275   :  { %v741_v49 = vpop.xlane.xlu1 %740 }
 0x276   :  { %v831_v28 = vsub.f32 %v1633_v48, %v741_v49  ;;  %v735_v52 = vpop.xlane.xlu0 %734 }
 0x277   :  { %v829_v53 = vsub.f32 %v1635_v26, %v735_v52 }
 0x278   :  { %v865_v56 = vmul.f32 1.442695, %v831_v28 }
 0x279   :  { %v861_v59 = vmul.f32 1.442695, %v829_v53  ;;  %v744_v60 = vpop.xlane.xlu1 %743 }
 0x27a   :  { %1321 = vpow2.f32 %v865_v56  ;;  %v832_v61 = vsub.f32 %v1639_v50, %v744_v60  ;;  %v738_v0 = vpop.xlane.xlu0 %737 }
 0x27b   :  { %v830_v3 = vsub.f32 %v1643_v51, %v738_v0  ;;  %1323 = vpow2.f32 %v861_v59 }
 0x27c   :  { %v867_v4 = vmul.f32 1.442695, %v832_v61 }
 0x27d   :  { %v863_v5 = vmul.f32 1.442695, %v830_v3 }
 0x27e   :  { %1325 = vpow2.f32 %v867_v4  ;;  %v753_v8 = vpop.xlane.xlu0 %752 }
 0x27f   :  { %v835_v11 = vsub.f32 %v1649_v54, %v753_v8  ;;  %v756_v48 = vpop.xlane.xlu1 %755  ;;  %1327 = vpow2.f32 %v863_v5 }
 0x280   :  { %v836_v26 = vsub.f32 %v1655_v57, %v756_v48 }
 0x281   :  { %v873_v12 = vmul.f32 1.442695, %v835_v11 }
 0x282   :  { %v875_v13 = vmul.f32 1.442695, %v836_v26  ;;  %v747_v16 = vpop.xlane.xlu0 %746 }
 0x283   :  { %1329 = vpow2.f32 %v873_v12  ;;  %v833_v50 = vsub.f32 %v1651_v55, %v747_v16  ;;  %v750_v19 = vpop.xlane.xlu1 %749 }
 0x284   :  { %v1768_v20 = vpop.eup %1321  ;;  %1331 = vpow2.f32 %v875_v13  ;;  %v834_v51 = vsub.f32 %v1657_v58, %v750_v19 }
 0x285   :  { %v869_v21 = vmul.f32 1.442695, %v833_v50  ;;  %v931_v54 = vsel %vm523_vm0, %v1768_v20, 0.0  ;;  %v1773_v24 = vpop.eup %1323 }
 0x286   :  { %v871_v29 = vmul.f32 1.442695, %v834_v51  ;;  %v765_v57 = vpop.xlane.xlu0 %764  ;;  %932 = vadd.xlane.f32.xlu0 %v931_v54  ;;  %v925_v58 = vsel %vm523_vm0, %v1773_v24, 0.0 }
 0x287   :  { %1333 = vpow2.f32 %v869_v21  ;;  %v839_v30 = vsub.f32 %v1665_v62, %v765_v57  ;;  %v768_v31 = vpop.xlane.xlu1 %767 }
 0x288   :  { %v1776_v55 = vpop.eup %1325  ;;  %1335 = vpow2.f32 %v871_v29  ;;  %v840_v34 = vsub.f32 %v1671_v1, %v768_v31 }
 0x289   :  { %v881_v37 = vmul.f32 1.442695, %v839_v30  ;;  %v934_v38 = vsel %vm523_vm0, %v1776_v55, 0.0  ;;  %v1783_v39 = vpop.eup %1327 }
 0x28a   :  { %v883_v43 = vmul.f32 1.442695, %v840_v34  ;;  %v759_v45 = vpop.xlane.xlu0 %758  ;;  %926 = vadd.xlane.f32.xlu0 %v925_v58  ;;  %935 = vadd.xlane.f32.xlu1 %v934_v38  ;;  %v928_v28 = vsel %vm523_vm0, %v1783_v39, 0.0 }
 0x28b   :  { %1337 = vpow2.f32 %v881_v37  ;;  %v837_v62 = vsub.f32 %v1667_v63, %v759_v45  ;;  %v762_v46 = vpop.xlane.xlu1 %761 }
 0x28c   :  { %1339 = vpow2.f32 %v883_v43  ;;  %v838_v1 = vsub.f32 %v1673_v2, %v762_v46 }
 0x28d   :  { %v1787_v47 = vpop.eup %1329  ;;  %v877_v49 = vmul.f32 1.442695, %v837_v62 }
 0x28e   :  { %v1791_v52 = vpop.eup %1331  ;;  %v879_v53 = vmul.f32 1.442695, %v838_v1  ;;  %v777_v56 = vpop.xlane.xlu0 %776  ;;  %929 = vadd.xlane.f32.xlu1 %v928_v28  ;;  %v943_v59 = vsel %vm523_vm0, %v1787_v47, 0.0 }
 0x28f   :  { %1341 = vpow2.f32 %v877_v49  ;;  %v843_v63 = vsub.f32 %v1681_v6, %v777_v56  ;;  %v780_v60 = vpop.xlane.xlu1 %779  ;;  %944 = vadd.xlane.f32.xlu0 %v943_v59  ;;  %v946_v3 = vsel %vm523_vm0, %v1791_v52, 0.0 }
 0x290   :  { %1343 = vpow2.f32 %v879_v53  ;;  %v844_v2 = vsub.f32 %v1687_v9, %v780_v60 }
 0x291   :  { %v1797_v61 = vpop.eup %1333  ;;  %v889_v0 = vmul.f32 1.442695, %v843_v63 }
 0x292   :  { %v1801_v4 = vpop.eup %1335  ;;  %v891_v5 = vmul.f32 1.442695, %v844_v2  ;;  %v771_v8 = vpop.xlane.xlu0 %770  ;;  %947 = vadd.xlane.f32.xlu1 %v946_v3  ;;  %v937_v11 = vsel %vm523_vm0, %v1797_v61, 0.0 }
 0x293   :  { %1345 = vpow2.f32 %v889_v0  ;;  %v841_v6 = vsub.f32 %v1683_v7, %v771_v8  ;;  %v774_v48 = vpop.xlane.xlu1 %773  ;;  %938 = vadd.xlane.f32.xlu0 %v937_v11  ;;  %v940_v13 = vsel %vm523_vm0, %v1801_v4, 0.0 }
 0x294   :  { %1347 = vpow2.f32 %v891_v5  ;;  %v842_v9 = vsub.f32 %v1689_v10, %v774_v48 }
 0x295   :  { %v1807_v26 = vpop.eup %1337  ;;  %v885_v12 = vmul.f32 1.442695, %v841_v6 }
 0x296   :  { %v1811_v16 = vpop.eup %1339  ;;  %v887_v50 = vmul.f32 1.442695, %v842_v9  ;;  %v789_v19 = vpop.xlane.xlu0 %788  ;;  %941 = vadd.xlane.f32.xlu1 %v940_v13  ;;  %v955_v51 = vsel %vm523_vm0, %v1807_v26, 0.0 }
 0x297   :  { %1349 = vpow2.f32 %v885_v12  ;;  %v847_v7 = vsub.f32 %v1697_v14, %v789_v19  ;;  %v792_v21 = vpop.xlane.xlu1 %791  ;;  %956 = vadd.xlane.f32.xlu0 %v955_v51  ;;  %v958_v57 = vsel %vm523_vm0, %v1811_v16, 0.0 }
 0x298   :  { %1351 = vpow2.f32 %v887_v50  ;;  %v848_v10 = vsub.f32 %v1703_v17, %v792_v21 }
 0x299   :  { %v1817_v54 = vpop.eup %1341  ;;  %v897_v29 = vmul.f32 1.442695, %v847_v7 }
 0x29a   :  { %v1821_v30 = vpop.eup %1343  ;;  %v899_v31 = vmul.f32 1.442695, %v848_v10  ;;  %v783_v34 = vpop.xlane.xlu0 %782  ;;  %959 = vadd.xlane.f32.xlu1 %v958_v57  ;;  %v949_v37 = vsel %vm523_vm0, %v1817_v54, 0.0 }
 0x29b   :  { %1353 = vpow2.f32 %v897_v29  ;;  %v845_v14 = vsub.f32 %v1699_v15, %v783_v34  ;;  %v786_v58 = vpop.xlane.xlu1 %785  ;;  %950 = vadd.xlane.f32.xlu0 %v949_v37  ;;  %v952_v45 = vsel %vm523_vm0, %v1821_v30, 0.0 }
 0x29c   :  { %1355 = vpow2.f32 %v899_v31  ;;  %v846_v17 = vsub.f32 %v1705_v18, %v786_v58 }
 0x29d   :  { %v1827_v38 = vpop.eup %1345  ;;  %v893_v43 = vmul.f32 1.442695, %v845_v14 }
 0x29e   :  { %v1831_v62 = vpop.eup %1347  ;;  %v895_v46 = vmul.f32 1.442695, %v846_v17  ;;  %v801_v1 = vpop.xlane.xlu0 %800  ;;  %953 = vadd.xlane.f32.xlu1 %v952_v45  ;;  %v967_v49 = vsel %vm523_vm0, %v1827_v38, 0.0 }
 0x29f   :  { %1357 = vpow2.f32 %v893_v43  ;;  %v851_v15 = vsub.f32 %v1713_v22, %v801_v1  ;;  %v804_v28 = vpop.xlane.xlu1 %803  ;;  %968 = vadd.xlane.f32.xlu0 %v967_v49  ;;  %v970_v59 = vsel %vm523_vm0, %v1831_v62, 0.0 }
 0x2a0   :  { %1359 = vpow2.f32 %v895_v46  ;;  %v852_v18 = vsub.f32 %v1719_v25, %v804_v28 }
 0x2a1   :  { %v1837_v53 = vpop.eup %1349  ;;  %v905_v56 = vmul.f32 1.442695, %v851_v15 }
 0x2a2   :  { %v1841_v63 = vpop.eup %1351  ;;  %v907_v60 = vmul.f32 1.442695, %v852_v18  ;;  %v795_v2 = vpop.xlane.xlu0 %794  ;;  %971 = vadd.xlane.f32.xlu1 %v970_v59  ;;  %v961_v0 = vsel %vm523_vm0, %v1837_v53, 0.0 }
 0x2a3   :  { %1361 = vpow2.f32 %v905_v56  ;;  %v849_v22 = vsub.f32 %v1715_v23, %v795_v2  ;;  %v798_v3 = vpop.xlane.xlu1 %797  ;;  %962 = vadd.xlane.f32.xlu0 %v961_v0  ;;  %v964_v11 = vsel %vm523_vm0, %v1841_v63, 0.0 }
 0x2a4   :  { %1363 = vpow2.f32 %v907_v60  ;;  %v850_v25 = vsub.f32 %v1721_v27, %v798_v3 }
 0x2a5   :  { %v1847_v5 = vpop.eup %1353  ;;  %v901_v8 = vmul.f32 1.442695, %v849_v22 }
 0x2a6   :  { %v1851_v6 = vpop.eup %1355  ;;  %v903_v48 = vmul.f32 1.442695, %v850_v25  ;;  %v813_v9 = vpop.xlane.xlu0 %812  ;;  %965 = vadd.xlane.f32.xlu1 %v964_v11  ;;  %v979_v12 = vsel %vm523_vm0, %v1847_v5, 0.0 }
 0x2a7   :  { %1365 = vpow2.f32 %v901_v8  ;;  %v855_v23 = vsub.f32 %v1729_v32, %v813_v9  ;;  %v816_v13 = vpop.xlane.xlu1 %815  ;;  %980 = vadd.xlane.f32.xlu0 %v979_v12  ;;  %v982_v51 = vsel %vm523_vm0, %v1851_v6, 0.0 }
 0x2a8   :  { %1367 = vpow2.f32 %v903_v48  ;;  %v856_v27 = vsub.f32 %v1735_v35, %v816_v13 }
 0x2a9   :  { %v1857_v50 = vpop.eup %1357  ;;  %v913_v19 = vmul.f32 1.442695, %v855_v23 }
 0x2aa   :  { %v1861_v7 = vpop.eup %1359  ;;  %v915_v21 = vmul.f32 1.442695, %v856_v27  ;;  %v807_v10 = vpop.xlane.xlu0 %806  ;;  %983 = vadd.xlane.f32.xlu1 %v982_v51  ;;  %v973_v29 = vsel %vm523_vm0, %v1857_v50, 0.0 }
 0x2ab   :  { %1369 = vpow2.f32 %v913_v19  ;;  %v853_v32 = vsub.f32 %v1731_v33, %v807_v10  ;;  %v810_v57 = vpop.xlane.xlu1 %809  ;;  %974 = vadd.xlane.f32.xlu0 %v973_v29  ;;  %v976_v37 = vsel %vm523_vm0, %v1861_v7, 0.0 }
 0x2ac   :  { %1371 = vpow2.f32 %v915_v21  ;;  %v854_v35 = vsub.f32 %v1737_v36, %v810_v57 }
 0x2ad   :  { %v1867_v31 = vpop.eup %1361  ;;  %v909_v34 = vmul.f32 1.442695, %v853_v32 }
 0x2ae   :  { %v1871_v14 = vpop.eup %1363  ;;  %v911_v58 = vmul.f32 1.442695, %v854_v35  ;;  %v819_v17 = vpop.xlane.xlu0 %818  ;;  %977 = vadd.xlane.f32.xlu1 %v976_v37  ;;  %v991_v43 = vsel %vm523_vm0, %v1867_v31, 0.0 }
 0x2af   :  { %1373 = vpow2.f32 %v909_v34  ;;  %v857_v33 = vsub.f32 %v1747_v41, %v819_v17  ;;  %992 = vadd.xlane.f32.xlu0 %v991_v43  ;;  %v994_v49 = vsel %vm523_vm0, %v1871_v14, 0.0 }
 0x2b0   :  { %1375 = vpow2.f32 %v911_v58  ;;  %v822_v36 = vpop.xlane.xlu1 %821 }
 0x2b1   :  { %v1876_v45 = vpop.eup %1365  ;;  %v917_v46 = vmul.f32 1.442695, %v857_v33  ;;  %v858_v1 = vsub.f32 %v1753_v44, %v822_v36 }
 0x2b2   :  { %v1881_v15 = vpop.eup %1367  ;;  %v825_v28 = vpop.xlane.xlu0 %824  ;;  %995 = vadd.xlane.f32.xlu1 %v994_v49  ;;  %v985_v18 = vsel %vm523_vm0, %v1876_v45, 0.0 }
 0x2b3   :  { %1377 = vpow2.f32 %v917_v46  ;;  %v919_v41 = vmul.f32 1.442695, %v858_v1  ;;  %v859_v56 = vsub.f32 %v1745_v40, %v825_v28  ;;  %986 = vadd.xlane.f32.xlu0 %v985_v18  ;;  %v988_v0 = vsel %vm523_vm0, %v1881_v15, 0.0 }
 0x2b4   :  { %v828_v59 = vpop.xlane.xlu1 %827 }
 0x2b5   :  { %v1886_v60 = vpop.eup %1369  ;;  %1379 = vpow2.f32 %v919_v41  ;;  %v921_v44 = vmul.f32 1.442695, %v859_v56  ;;  %v860_v2 = vsub.f32 %v1749_v42, %v828_v59 }
 0x2b6   :  { %v1891_v22 = vpop.eup %1371  ;;  %989 = vadd.xlane.f32.xlu1 %v988_v0  ;;  %v1003_v3 = vsel %vm523_vm0, %v1886_v60, 0.0 }
 0x2b7   :  { %1381 = vpow2.f32 %v921_v44  ;;  %v923_v25 = vmul.f32 1.442695, %v860_v2  ;;  %1004 = vadd.xlane.f32.xlu0 %v1003_v3  ;;  %v1006_v8 = vsel %vm523_vm0, %v1891_v22, 0.0 }
 0x2b9   :  { %v1895_v40 = vpop.eup %1373  ;;  %1383 = vpow2.f32 %v923_v25 }
 0x2ba   :  { %v1899_v11 = vpop.eup %1375  ;;  %1007 = vadd.xlane.f32.xlu1 %v1006_v8  ;;  %v997_v42 = vsel %vm523_vm0, %v1895_v40, 0.0 }
 0x2bb   :  { %998 = vadd.xlane.f32.xlu0 %v997_v42  ;;  %v1000_v9 = vsel %vm523_vm0, %v1899_v11, 0.0 }
 0x2bd   :  { %v1903_v48 = vpop.eup %1377 }
 0x2be   :  { %1001 = vadd.xlane.f32.xlu1 %v1000_v9  ;;  %v1009_v12 = vsel %vm523_vm0, %v1903_v48, 0.0 }
 0x2bf   :  { %v1909_v23 = vpop.eup %1379  ;;  %1010 = vadd.xlane.f32.xlu0 %v1009_v12 }
 0x2c0   :  { %v1012_v13 = vsel %vm523_vm0, %v1909_v23, 0.0 }
 0x2c1   :  { %v1913_v27 = vpop.eup %1381 }
 0x2c2   :  { %1013 = vadd.xlane.f32.xlu1 %v1012_v13  ;;  %v1015_v19 = vsel %vm523_vm0, %v1913_v27, 0.0 }
 0x2c3   :  { %v1917_v51 = vpop.eup %1383  ;;  %1016 = vadd.xlane.f32.xlu0 %v1015_v19 }
 0x2c4   :  { %v1018_v21 = vsel %vm523_vm0, %v1917_v51, 0.0 }
 0x2c6   :  { %1019 = vadd.xlane.f32.xlu1 %v1018_v21 }
 0x313   :  { %v933_v10 = vpop.xlane.xlu0 %932 }
 0x314   :  { %1385 = vrcp.f32 %v933_v10 }
 0x317   :  { %v927_v29 = vpop.xlane.xlu0 %926  ;;  %v936_v32 = vpop.xlane.xlu1 %935 }
 0x318   :  { %1387 = vrcp.f32 %v927_v29 }
 0x319   :  { %1389 = vrcp.f32 %v936_v32 }
 0x31b   :  { %v930_v57 = vpop.xlane.xlu1 %929 }
 0x31c   :  { %1391 = vrcp.f32 %v930_v57  ;;  %v945_v35 = vpop.xlane.xlu0 %944 }
 0x31d   :  { %1393 = vrcp.f32 %v945_v35 }
 0x31e   :  { %v1386_v34 = vpop.eup %1385 }
 0x31f   :  { %v1026_v37 = vmul.f32 %v1386_v34, %v1768_v20  ;;  %v948_v58 = vpop.xlane.xlu1 %947 }
 0x320   :  { %1395 = vrcp.f32 %v948_v58  ;;  %v939_v17 = vpop.xlane.xlu0 %938 }
 0x321   :  { %1087 = vst.msk [vmem:[%s2085_s4 + $0x10] sm:$0xff] %vm523_vm0, %v1026_v37  ;;  %1397 = vrcp.f32 %v939_v17 }
 0x322   :  { %v1388_v43 = vpop.eup %1387 }
 0x323   :  { %v1390_v33 = vpop.eup %1389  ;;  %v1022_v36 = vmul.f32 %v1388_v43, %v1773_v24  ;;  %v942_v46 = vpop.xlane.xlu1 %941 }
 0x324   :  { %v1028_v1 = vmul.f32 %v1390_v33, %v1776_v55  ;;  %1399 = vrcp.f32 %v942_v46  ;;  %v957_v49 = vpop.xlane.xlu0 %956 }
 0x325   :  { %1085 = vst.msk [vmem:[%s2085_s4] sm:$0xff] %vm523_vm0, %v1022_v36  ;;  %1401 = vrcp.f32 %v957_v49 }
 0x326   :  { %v1392_v20 = vpop.eup %1391  ;;  %1088 = vst.msk [vmem:[%s2085_s4 + $0x18] sm:$0xff] %vm523_vm0, %v1028_v1 }
 0x327   :  { %v1394_v28 = vpop.eup %1393  ;;  %v1024_v24 = vmul.f32 %v1392_v20, %v1783_v39  ;;  %v960_v18 = vpop.xlane.xlu1 %959 }
 0x328   :  { %v1034_v55 = vmul.f32 %v1394_v28, %v1787_v47  ;;  %1403 = vrcp.f32 %v960_v18  ;;  %v951_v41 = vpop.xlane.xlu0 %950 }
 0x329   :  { %1086 = vst.msk [vmem:[%s2085_s4 + $0x8] sm:$0xff] %vm523_vm0, %v1024_v24  ;;  %1405 = vrcp.f32 %v951_v41 }
 0x32a   :  { %v1396_v56 = vpop.eup %1395  ;;  %1091 = vst.msk [vmem:[%s2085_s4 + $0x30] sm:$0xff] %vm523_vm0, %v1034_v55 }
 0x32b   :  { %v1398_v59 = vpop.eup %1397  ;;  %v1036_v39 = vmul.f32 %v1396_v56, %v1791_v52  ;;  %v954_v44 = vpop.xlane.xlu1 %953 }
 0x32c   :  { %v1030_v47 = vmul.f32 %v1398_v59, %v1797_v61  ;;  %1407 = vrcp.f32 %v954_v44  ;;  %v969_v2 = vpop.xlane.xlu0 %968 }
 0x32d   :  { %1092 = vst.msk [vmem:[%s2085_s4 + $0x38] sm:$0xff] %vm523_vm0, %v1036_v39  ;;  %1409 = vrcp.f32 %v969_v2 }
 0x32e   :  { %v1400_v0 = vpop.eup %1399  ;;  %1089 = vst.msk [vmem:[%s2085_s4 + $0x20] sm:$0xff] %vm523_vm0, %v1030_v47 }
 0x32f   :  { %v1402_v3 = vpop.eup %1401  ;;  %v1032_v52 = vmul.f32 %v1400_v0, %v1801_v4  ;;  %v972_v25 = vpop.xlane.xlu1 %971 }
 0x330   :  { %v1042_v61 = vmul.f32 %v1402_v3, %v1807_v26  ;;  %1411 = vrcp.f32 %v972_v25  ;;  %v963_v8 = vpop.xlane.xlu0 %962 }
 0x331   :  { %1090 = vst.msk [vmem:[%s2085_s4 + $0x28] sm:$0xff] %vm523_vm0, %v1032_v52  ;;  %1413 = vrcp.f32 %v963_v8 }
 0x332   :  { %v1404_v42 = vpop.eup %1403  ;;  %1095 = vst.msk [vmem:[%s2085_s4 + $0x50] sm:$0xff] %vm523_vm0, %v1042_v61 }
 0x333   :  { %v1406_v9 = vpop.eup %1405  ;;  %v1044_v4 = vmul.f32 %v1404_v42, %v1811_v16  ;;  %v966_v12 = vpop.xlane.xlu1 %965 }
 0x334   :  { %v1038_v26 = vmul.f32 %v1406_v9, %v1817_v54  ;;  %1415 = vrcp.f32 %v966_v12  ;;  %v981_v13 = vpop.xlane.xlu0 %980 }
 0x335   :  { %1096 = vst.msk [vmem:[%s2085_s4 + $0x58] sm:$0xff] %vm523_vm0, %v1044_v4  ;;  %1417 = vrcp.f32 %v981_v13 }
 0x336   :  { %v1408_v19 = vpop.eup %1407  ;;  %1093 = vst.msk [vmem:[%s2085_s4 + $0x40] sm:$0xff] %vm523_vm0, %v1038_v26 }
 0x337   :  { %v1410_v21 = vpop.eup %1409  ;;  %v1040_v16 = vmul.f32 %v1408_v19, %v1821_v30  ;;  %v984_v10 = vpop.xlane.xlu1 %983 }
 0x338   :  { %v1050_v54 = vmul.f32 %v1410_v21, %v1827_v38  ;;  %1419 = vrcp.f32 %v984_v10  ;;  %v975_v29 = vpop.xlane.xlu0 %974 }
 0x339   :  { %1094 = vst.msk [vmem:[%s2085_s4 + $0x48] sm:$0xff] %vm523_vm0, %v1040_v16  ;;  %1421 = vrcp.f32 %v975_v29 }
 0x33a   :  { %v1412_v32 = vpop.eup %1411  ;;  %1099 = vst.msk [vmem:[%s2085_s4 + $0x70] sm:$0xff] %vm523_vm0, %v1050_v54 }
 0x33b   :  { %v1414_v57 = vpop.eup %1413  ;;  %v1052_v30 = vmul.f32 %v1412_v32, %v1831_v62  ;;  %v978_v35 = vpop.xlane.xlu1 %977 }
 0x33c   :  { %v1046_v38 = vmul.f32 %v1414_v57, %v1837_v53  ;;  %1423 = vrcp.f32 %v978_v35  ;;  %v993_v34 = vpop.xlane.xlu0 %992 }
 0x33d   :  { %1100 = vst.msk [vmem:[%s2085_s4 + $0x78] sm:$0xff] %vm523_vm0, %v1052_v30  ;;  %1425 = vrcp.f32 %v993_v34 }
 0x33e   :  { %v1416_v37 = vpop.eup %1415  ;;  %1097 = vst.msk [vmem:[%s2085_s4 + $0x60] sm:$0xff] %vm523_vm0, %v1046_v38 }
 0x33f   :  { %v1418_v58 = vpop.eup %1417  ;;  %v1048_v62 = vmul.f32 %v1416_v37, %v1841_v63  ;;  %v996_v17 = vpop.xlane.xlu1 %995 }
 0x340   :  { %v1058_v53 = vmul.f32 %v1418_v58, %v1847_v5  ;;  %1427 = vrcp.f32 %v996_v17  ;;  %v987_v43 = vpop.xlane.xlu0 %986 }
 0x341   :  { %1098 = vst.msk [vmem:[%s2085_s4 + $0x68] sm:$0xff] %vm523_vm0, %v1048_v62  ;;  %1429 = vrcp.f32 %v987_v43 }
 0x342   :  { %v1420_v33 = vpop.eup %1419  ;;  %1103 = vst.msk [vmem:[%s2085_s4 + $0x90] sm:$0xff] %vm523_vm0, %v1058_v53 }
 0x343   :  { %v1422_v36 = vpop.eup %1421  ;;  %v1060_v63 = vmul.f32 %v1420_v33, %v1851_v6  ;;  %v990_v46 = vpop.xlane.xlu1 %989 }
 0x344   :  { %v1054_v5 = vmul.f32 %v1422_v36, %v1857_v50  ;;  %1431 = vrcp.f32 %v990_v46  ;;  %v1005_v1 = vpop.xlane.xlu0 %1004 }
 0x345   :  { %1104 = vst.msk [vmem:[%s2085_s4 + $0x98] sm:$0xff] %vm523_vm0, %v1060_v63  ;;  %1433 = vrcp.f32 %v1005_v1 }
 0x346   :  { %v1424_v49 = vpop.eup %1423  ;;  %1101 = vst.msk [vmem:[%s2085_s4 + $0x80] sm:$0xff] %vm523_vm0, %v1054_v5 }
 0x347   :  { %v1426_v20 = vpop.eup %1425  ;;  %v1056_v6 = vmul.f32 %v1424_v49, %v1861_v7  ;;  %v1008_v28 = vpop.xlane.xlu1 %1007 }
 0x348   :  { %v1066_v50 = vmul.f32 %v1426_v20, %v1867_v31  ;;  %1435 = vrcp.f32 %v1008_v28  ;;  %v999_v24 = vpop.xlane.xlu0 %998 }
 0x349   :  { %1102 = vst.msk [vmem:[%s2085_s4 + $0x88] sm:$0xff] %vm523_vm0, %v1056_v6  ;;  %1437 = vrcp.f32 %v999_v24 }
 0x34a   :  { %v1428_v18 = vpop.eup %1427  ;;  %1107 = vst.msk [vmem:[%s2085_s4 + $0xb0] sm:$0xff] %vm523_vm0, %v1066_v50 }
 0x34b   :  { %v1430_v55 = vpop.eup %1429  ;;  %v1068_v7 = vmul.f32 %v1428_v18, %v1871_v14  ;;  %v1002_v41 = vpop.xlane.xlu1 %1001 }
 0x34c   :  { %v1062_v31 = vmul.f32 %v1430_v55, %v1876_v45  ;;  %1439 = vrcp.f32 %v1002_v41  ;;  %v1011_v56 = vpop.xlane.xlu0 %1010 }
 0x34d   :  { %1108 = vst.msk [vmem:[%s2085_s4 + $0xb8] sm:$0xff] %vm523_vm0, %v1068_v7  ;;  %1441 = vrcp.f32 %v1011_v56 }
 0x34e   :  { %v1432_v59 = vpop.eup %1431  ;;  %1105 = vst.msk [vmem:[%s2085_s4 + $0xa0] sm:$0xff] %vm523_vm0, %v1062_v31 }
 0x34f   :  { %v1434_v39 = vpop.eup %1433  ;;  %v1064_v14 = vmul.f32 %v1432_v59, %v1881_v15  ;;  %v1014_v44 = vpop.xlane.xlu1 %1013 }
 0x350   :  { %v1074_v45 = vmul.f32 %v1434_v39, %v1886_v60  ;;  %1443 = vrcp.f32 %v1014_v44  ;;  %v1017_v47 = vpop.xlane.xlu0 %1016 }
 0x351   :  { %1106 = vst.msk [vmem:[%s2085_s4 + $0xa8] sm:$0xff] %vm523_vm0, %v1064_v14  ;;  %1445 = vrcp.f32 %v1017_v47 }
 0x352   :  { %v1436_v2 = vpop.eup %1435  ;;  %1111 = vst.msk [vmem:[%s2085_s4 + $0xd0] sm:$0xff] %vm523_vm0, %v1074_v45 }
 0x353   :  { %v1438_v0 = vpop.eup %1437  ;;  %v1076_v15 = vmul.f32 %v1436_v2, %v1891_v22  ;;  %v1020_v3 = vpop.xlane.xlu1 %1019 }
 0x354   :  { %v1070_v60 = vmul.f32 %v1438_v0, %v1895_v40  ;;  %1447 = vrcp.f32 %v1020_v3 }
 0x355   :  { %1112 = vst.msk [vmem:[%s2085_s4 + $0xd8] sm:$0xff] %vm523_vm0, %v1076_v15 }
 0x356   :  { %v1440_v52 = vpop.eup %1439  ;;  %1109 = vst.msk [vmem:[%s2085_s4 + $0xc0] sm:$0xff] %vm523_vm0, %v1070_v60 }
 0x357   :  { %v1442_v25 = vpop.eup %1441  ;;  %v1072_v61 = vmul.f32 %v1440_v52, %v1899_v11 }
 0x358   :  { %v1078_v22 = vmul.f32 %v1442_v25, %v1903_v48 }
 0x359   :  { %1110 = vst.msk [vmem:[%s2085_s4 + $0xc8] sm:$0xff] %vm523_vm0, %v1072_v61 }
 0x35a   :  { %v1444_v40 = vpop.eup %1443  ;;  %1113 = vst.msk [vmem:[%s2085_s4 + $0xe0] sm:$0xff] %vm523_vm0, %v1078_v22 }
 0x35b   :  { %v1446_v8 = vpop.eup %1445  ;;  %v1080_v42 = vmul.f32 %v1444_v40, %v1909_v23 }
 0x35c   :  { %v1082_v9 = vmul.f32 %v1446_v8, %v1913_v27 }
 0x35d   :  { %1114 = vst.msk [vmem:[%s2085_s4 + $0xe8] sm:$0xff] %vm523_vm0, %v1080_v42 }
 0x35e   :  { %v1448_v11 = vpop.eup %1447  ;;  %1115 = vst.msk [vmem:[%s2085_s4 + $0xf0] sm:$0xff] %vm523_vm0, %v1082_v9 }
 0x35f   :  { %v1084_v48 = vmul.f32 %v1448_v11, %v1917_v51 }
 0x361   :  { %1116 = vst.msk [vmem:[%s2085_s4 + $0xf8] sm:$0xff] %vm523_vm0, %v1084_v48 }
 0x362   :  { %1121 = vsyncpa [#allocation3], 1 }

</bundles_post_ra>
